<compile_context>
chip_gen: v7x
topology: tpu7x:2x2x1
jax: 0.10.0
libtpu: 0.0.40
codegen_flags: <defaults>
</compile_context>

<pallas_src>
import jax
import jax.numpy as jnp
from jax import lax
from jax.experimental import pallas as pl
from jax.experimental.pallas import tpu as pltpu

BN_EPS = 0.001
K = 3  # ConvTranspose kernel size


# ---------------------------------------------------------------------------
# Pallas kernels
# ---------------------------------------------------------------------------
def _conv_stats_kernel(xcol_ref, w_ref, y_ref, stats_ref):
    # xcol_ref: (TM, 4*Cin)    tap matrix tile
    # w_ref:    (4*Cin, 4*Cout) phase-grouped weights (resident, constant index)
    # y_ref:    (TM, 4*Cout)   pre-BN conv output tile
    # stats_ref:(1, 2, 4*Cout) per-tile [sum; sum-of-squares]
    y = jnp.dot(xcol_ref[...], w_ref[...], preferred_element_type=jnp.float32)
    y_ref[...] = y
    s = jnp.sum(y, axis=0, keepdims=True)        # (1, 4*Cout)  (XLU reduce)
    ss = jnp.sum(y * y, axis=0, keepdims=True)   # (1, 4*Cout)
    stats_ref[...] = jnp.concatenate([s, ss], axis=0)[None, :, :]


def _norm_kernel(y_ref, scale_ref, shift_ref, o_ref):
    # Pure-VPU fused BN affine + ReLU on the materialized conv output.
    o_ref[...] = jnp.maximum(y_ref[...] * scale_ref[...] + shift_ref[...], 0.0)


# ---------------------------------------------------------------------------
# Wrapper
# ---------------------------------------------------------------------------
def upsampler_block(x_nchw, weight, bias, gamma, beta, *, tm=1024):
    """Forward pass matching the PyTorch UpsamplerBlock (training-mode BN).

    x_nchw: (N, Cin, H, W) float32
    weight: (Cin, Cout, 3, 3)  -- PyTorch ConvTranspose2d weight layout
    bias, gamma, beta: (Cout,)
    returns (N, Cout, 2H, 2W) float32
    """
    del bias  # conv bias is exactly cancelled by BN's batch-mean subtraction
    N, Cin, H, W = x_nchw.shape
    Cout = weight.shape[1]
    Ho, Wo = 2 * H, 2 * W
    M = N * H * W
    C4i, C4o = 4 * Cin, 4 * Cout

    # --- glue: phase-decomposition tap matrix (M, 4*Cin) ------------------
    # taps (dh, dw) in {0,1}^2 of the UNdilated NHWC input, padded by one row/col
    # at the bottom/right (those reads fall outside the valid input).
    x = jnp.transpose(x_nchw, (0, 2, 3, 1)).astype(jnp.float32)   # NHWC
    xp = jnp.pad(x, ((0, 0), (0, 1), (0, 1), (0, 0)))
    taps = [xp[:, dh:dh + H, dw:dw + W, :].reshape(M, Cin)
            for dh in (0, 1) for dw in (0, 1)]
    xcol = jnp.concatenate(taps, axis=1)                          # (M, 4*Cin)

    # --- glue: phase-grouped weight matrix (4*Cin, 4*Cout) ----------------
    # output phase (a, b) = (row parity, col parity); tap (dh, dw) contributes
    # through kernel position (kh, kw) = (a + 1 - 2*dh, b + 1 - 2*dw) when valid.
    w = weight.astype(jnp.float32)
    W_all = jnp.zeros((C4i, C4o), jnp.float32)
    for dh in (0, 1):
        for dw in (0, 1):
            for a in (0, 1):
                for b in (0, 1):
                    kh, kw = a + 1 - 2 * dh, b + 1 - 2 * dw
                    if 0 <= kh < K and 0 <= kw < K:
                        t, p = dh * 2 + dw, a * 2 + b
                        W_all = W_all.at[t * Cin:(t + 1) * Cin,
                                         p * Cout:(p + 1) * Cout].set(w[:, :, kh, kw])

    # --- row tiling over M (grid axis, auto double-buffered) --------------
    def _rup(v, m):
        return (v + m - 1) // m * m

    TM = min(tm, _rup(M, 8))            # sized for v7x's 64 MiB VMEM as well
    Mp = _rup(M, TM)
    G = Mp // TM
    if Mp != M:
        # zero rows contribute 0 to the BN sums; sliced off at the end
        xcol = jnp.pad(xcol, ((0, Mp - M), (0, 0)))

    cparams = pltpu.CompilerParams(
        dimension_semantics=("parallel",),       # shards across v7x's 2 TCs
        vmem_limit_bytes=32 * 1024 * 1024,
    )

    # --- pass 1: conv matmul -> y, plus per-tile channel sum / sum-sq -----
    y_full, stats = pl.pallas_call(
        _conv_stats_kernel,
        out_shape=(jax.ShapeDtypeStruct((Mp, C4o), jnp.float32),
                   jax.ShapeDtypeStruct((G, 2, C4o), jnp.float32)),
        grid=(G,),
        in_specs=[pl.BlockSpec((TM, C4i), lambda g: (g, 0)),
                  pl.BlockSpec((C4i, C4o), lambda g: (0, 0))],
        out_specs=[pl.BlockSpec((TM, C4o), lambda g: (g, 0)),
                   pl.BlockSpec((1, 2, C4o), lambda g: (g, 0, 0))],
        compiler_params=cparams,
    )(xcol, W_all)

    # --- glue: fold BN stats into one per-channel scale / shift -----------
    # TODO(synk): BatchNorm running_mean/running_var buffer updates (a training
    # side effect) are not emitted; the forward output does not depend on them.
    tot = jnp.sum(stats, axis=0)                     # (2, 4*Cout)
    cnt = jnp.float32(N * Ho * Wo)                   # real output positions/channel
    mean = jnp.sum(tot[0].reshape(4, Cout), axis=0) / cnt
    ex2 = jnp.sum(tot[1].reshape(4, Cout), axis=0) / cnt
    var = ex2 - mean * mean                          # biased variance (PyTorch BN)
    scale = gamma.astype(jnp.float32) * lax.rsqrt(var + BN_EPS)
    shift = beta.astype(jnp.float32) - mean * scale
    scale4 = jnp.tile(scale, 4).reshape(1, C4o)
    shift4 = jnp.tile(shift, 4).reshape(1, C4o)

    # --- pass 2: elementwise normalize + ReLU over the stored conv output --
    out2d = pl.pallas_call(
        _norm_kernel,
        out_shape=jax.ShapeDtypeStruct((Mp, C4o), jnp.float32),
        grid=(G,),
        in_specs=[pl.BlockSpec((TM, C4o), lambda g: (g, 0)),
                  pl.BlockSpec((1, C4o), lambda g: (0, 0)),
                  pl.BlockSpec((1, C4o), lambda g: (0, 0))],
        out_specs=pl.BlockSpec((TM, C4o), lambda g: (g, 0)),
        compiler_params=cparams,
    )(y_full, scale4, shift4)

    # --- glue: (M, 4*Cout) -> NCHW output ----------------------------------
    out = out2d[:M].reshape(N, H, W, 2, 2, Cout)
    out = jnp.transpose(out, (0, 1, 3, 2, 4, 5)).reshape(N, Ho, Wo, Cout)
    return jnp.transpose(out, (0, 3, 1, 2))


# ---------------------------------------------------------------------------
# Pure-JAX reference (lax conv with lhs dilation + batch-stat BN + ReLU)
# ---------------------------------------------------------------------------
def reference(x_nchw, weight, bias, gamma, beta):
    x = jnp.transpose(x_nchw, (0, 2, 3, 1)).astype(jnp.float32)
    w_hwio = jnp.transpose(weight, (2, 3, 0, 1))[::-1, ::-1]  # flipped, HWIO
    y = lax.conv_general_dilated(
        x, w_hwio, window_strides=(1, 1),
        padding=((1, 2), (1, 2)), lhs_dilation=(2, 2),
        dimension_numbers=('NHWC', 'HWIO', 'NHWC'))
    y = y + bias.reshape(1, 1, 1, -1)
    mean = jnp.mean(y, axis=(0, 1, 2), keepdims=True)
    var = jnp.mean((y - mean) ** 2, axis=(0, 1, 2), keepdims=True)
    y = (y - mean) * lax.rsqrt(var + BN_EPS) * gamma.reshape(1, 1, 1, -1) \
        + beta.reshape(1, 1, 1, -1)
    return jnp.transpose(jnp.maximum(y, 0.0), (0, 3, 1, 2))


if __name__ == "__main__":
    N, Cin, H, W = 2, 4, 16, 16
    Cout = 8

    key = jax.random.PRNGKey(0)
    kx, kw, kb, kg, kbt = jax.random.split(key, 5)
    x = jax.random.normal(kx, (N, Cin, H, W), jnp.float32)
    weight = 0.1 * jax.random.normal(kw, (Cin, Cout, K, K), jnp.float32)
    bias = 0.1 * jax.random.normal(kb, (Cout,), jnp.float32)
    gamma = 1.0 + 0.1 * jax.random.normal(kg, (Cout,), jnp.float32)
    beta = 0.05 * jax.random.normal(kbt, (Cout,), jnp.float32)

    out = jax.block_until_ready(upsampler_block(x, weight, bias, gamma, beta))
    assert out.shape == (N, Cout, 2 * H, 2 * W), out.shape

    ref = jax.block_until_ready(reference(x, weight, bias, gamma, beta))
    assert float(jnp.max(jnp.abs(out - ref))) < 1e-3, "mismatch vs JAX reference"

    print("KERNEL_OK")
</pallas_src>

<mosaic_0001>
module attributes {stable_mosaic.version = 11 : i64} {
  func.func @_conv_stats_kernel(%arg0: i32, %arg1: memref<512x16xf32, #tpu.memory_space<vmem>>, %arg2: memref<16x32xf32, #tpu.memory_space<vmem>>, %arg3: memref<512x32xf32, #tpu.memory_space<vmem>>, %arg4: memref<1x2x32xf32, #tpu.memory_space<vmem>>) attributes {dimension_semantics = [#tpu.dimension_semantics<parallel>], iteration_bounds = array<i64: 1>, scalar_prefetch = 0 : i64, scratch_operands = 0 : i64, tpu.core_type = #tpu.core_type<tc>, window_params = [{transform_indices = @transform_0, window_bounds = array<i64: 512, 16>}, {pipeline_mode = #tpu.pipeline_mode<synchronous>, transform_indices = @transform_1, window_bounds = array<i64: 16, 32>}, {transform_indices = @transform_2, window_bounds = array<i64: 512, 32>}, {transform_indices = @transform_3, window_bounds = array<i64: 1, 2, 32>}]} {
    %c0 = arith.constant 0 : index
    %c0_0 = arith.constant 0 : index
    %0 = vector.load %arg1[%c0, %c0_0] : memref<512x16xf32, #tpu.memory_space<vmem>>, vector<512x16xf32>
    %c0_1 = arith.constant 0 : index
    %c0_2 = arith.constant 0 : index
    %1 = vector.load %arg2[%c0_1, %c0_2] : memref<16x32xf32, #tpu.memory_space<vmem>>, vector<16x32xf32>
    %cst = arith.constant dense<0.000000e+00> : vector<512x32xf32>
    %2 = tpu.matmul %0, %1, %cst {dimension_numbers = #tpu.dot_dimension_numbers<[1], [0], [0], [1], [0, 0, 1, 1], [], []>} : vector<512x16xf32>, vector<16x32xf32>, vector<512x32xf32> -> vector<512x32xf32>
    %c0_3 = arith.constant 0 : index
    %c0_4 = arith.constant 0 : index
    %3 = vector.load %arg3[%c0_3, %c0_4] : memref<512x32xf32, #tpu.memory_space<vmem>>, vector<512x32xf32>
    tpu.vector_store %arg3[%c0_3, %c0_4], %2 {strides = array<i32>} : memref<512x32xf32, #tpu.memory_space<vmem>>, vector<512x32xf32>,
    %cst_5 = arith.constant dense<0.000000e+00> : vector<32xf32>
    %4 = vector.multi_reduction <add>, %2, %cst_5 [0] : vector<512x32xf32> to vector<32xf32>
    %5 = vector.shape_cast %4 : vector<32xf32> to vector<1x32xf32>
    %6 = arith.mulf %2, %2 : vector<512x32xf32>
    %cst_6 = arith.constant dense<0.000000e+00> : vector<32xf32>
    %7 = vector.multi_reduction <add>, %6, %cst_6 [0] : vector<512x32xf32> to vector<32xf32>
    %8 = vector.shape_cast %7 : vector<32xf32> to vector<1x32xf32>
    %9 = tpu.concatenate %5, %8 in 0 : vector<1x32xf32>, vector<1x32xf32> -> vector<2x32xf32>
    %10 = vector.shape_cast %9 : vector<2x32xf32> to vector<1x2x32xf32>
    %c0_7 = arith.constant 0 : index
    %c0_8 = arith.constant 0 : index
    %c0_9 = arith.constant 0 : index
    %11 = vector.load %arg4[%c0_7, %c0_8, %c0_9] : memref<1x2x32xf32, #tpu.memory_space<vmem>>, vector<1x2x32xf32>
    tpu.vector_store %arg4[%c0_7, %c0_8, %c0_9], %10 {strides = array<i32>} : memref<1x2x32xf32, #tpu.memory_space<vmem>>, vector<1x2x32xf32>,
    return
  }
  func.func @transform_0(%arg0: i32) -> (i32, i32) {
    %c0_i32 = arith.constant 0 : i32
    %c0_i32_0 = arith.constant 0 : i32
    return %arg0, %c0_i32 : i32, i32
  }
  func.func @transform_1(%arg0: i32) -> (i32, i32) {
    %c0_i32 = arith.constant 0 : i32
    %c0_i32_0 = arith.constant 0 : i32
    %c0_i32_1 = arith.constant 0 : i32
    return %c0_i32, %c0_i32_0 : i32, i32
  }
  func.func @transform_2(%arg0: i32) -> (i32, i32) {
    %c0_i32 = arith.constant 0 : i32
    %c0_i32_0 = arith.constant 0 : i32
    return %arg0, %c0_i32 : i32, i32
  }
  func.func @transform_3(%arg0: i32) -> (i32, i32, i32) {
    %c0_i32 = arith.constant 0 : i32
    %c0_i32_0 = arith.constant 0 : i32
    %c0_i32_1 = arith.constant 0 : i32
    return %arg0, %c0_i32, %c0_i32_0 : i32, i32, i32
  }
}

</mosaic_0001>

<bundles_post_ra>
// kernel: tpu_custom_call.1
= control target key start
LH: loop header
LB: loop body
LE: loop exit
PB: predicated region body
PF: predicated region fallthrough
CT: control target
= control target key end

     0   :  { %vm80_vm0 = vcmask 130048   ;;  %s2207_s0 = inlined_call_operand.vmem [shape: f32[512,16], index: 0, kind: input, shape index: {}]   ;;  %s2208_s1 = inlined_call_operand.vmem [shape: f32[16,32], index: 1, kind: input, shape index: {}]   ;;  %s2209_s2 = inlined_call_operand.vmem [shape: f32[512,32], index: 2, kind: output, shape index: {0}]   ;;  %s2210_s3 = inlined_call_operand.hbm [shape: f32[1,2,32], index: 3, kind: output, shape index: {1}]  }
   0x1   :  { %v78_v0 = vld [vmem:[%s2208_s1] sm:$0xff]  ;;  %v79_v1 = vld [vmem:[%s2208_s1 + $0x8] sm:$0xff]  ;;  %v16_v5 = vld [vmem:[%s2207_s0 + $0x10] sm:$0xff] }
   0x2   :  { %v14_v2 = vld [vmem:[%s2207_s0] sm:$0xff]  ;;  %v1305_v3 = vpack.c.bf16 %v79_v1, %v78_v0  ;;  %v15_v4 = vld [vmem:[%s2207_s0 + $0x8] sm:$0xff]  ;;  %v17_v6 = vld [vmem:[%s2207_s0 + $0x18] sm:$0xff] }
   0x3   :  { %1209 = vmatprep.mubr.msk.f32.mxu0 %vm80_vm0, %v14_v2  ;;  %v18_v7 = vld [vmem:[%s2207_s0 + $0x20] sm:$0xff]  ;;  %v47_v9 = vld [vmem:[%s2207_s0 + $0x108] sm:$0xff]  ;;  %v48_v11 = vld [vmem:[%s2207_s0 + $0x110] sm:$0xff] }
   0x4   :  { %1306 = vmatprep.subr.bf16.mxu0 %v1305_v3  ;;  %1309 = vmatprep.subr.bf16.mxu1 %v1305_v3  ;;  %v46_v8 = vld [vmem:[%s2207_s0 + $0x100] sm:$0xff]  ;;  %v19_v10 = vld [vmem:[%s2207_s0 + $0x28] sm:$0xff]  ;;  %v20_v12 = vld [vmem:[%s2207_s0 + $0x30] sm:$0xff] }
   0x5   :  { %1308 = vmatpush3.bf16.msra.mxu0 %v1305_v3  ;;  %1310 = vmatpush3.bf16.msra.mxu1 %v1305_v3  ;;  %v49_v13 = vld [vmem:[%s2207_s0 + $0x118] sm:$0xff]  ;;  %v50_v14 = vld [vmem:[%s2207_s0 + $0x120] sm:$0xff]  ;;  %v51_v17 = vld [vmem:[%s2207_s0 + $0x128] sm:$0xff] }
   0x6   :  { %1257 = vmatprep.mubr.msk.f32.mxu1 %vm80_vm0, %v46_v8  ;;  %v21_v15 = vld [vmem:[%s2207_s0 + $0x38] sm:$0xff]  ;;  %v22_v16 = vld [vmem:[%s2207_s0 + $0x40] sm:$0xff]  ;;  %v52_v18 = vld [vmem:[%s2207_s0 + $0x130] sm:$0xff] }
   0x7   :  { %v23_v19 = vld [vmem:[%s2207_s0 + $0x48] sm:$0xff]  ;;  %v24_v20 = vld [vmem:[%s2207_s0 + $0x50] sm:$0xff]  ;;  %v53_v21 = vld [vmem:[%s2207_s0 + $0x138] sm:$0xff] }
   0x8   :  { %1210 = vmatmul.mubr.msk.f32.vlgmr.msra.gmra.mrb[0].mxu0 %vm80_vm0, %v15_v4  ;;  %1258 = vmatmul.mubr.msk.f32.vlgmr.msra.gmra.mrb[0].mxu1 %vm80_vm0, %v47_v9 }
   0x9   :  { %1212 = vmatprep.mubr.msk.f32.mxu0 %vm80_vm0, %v16_v5  ;;  %1260 = vmatprep.mubr.msk.f32.mxu1 %vm80_vm0, %v48_v11 }
   0xc   :  { %1213 = vmatmul.mubr.msk.f32.gmra.mrb[2].mxu0 %vm80_vm0, %v17_v6  ;;  %1261 = vmatmul.mubr.msk.f32.gmra.mrb[2].mxu1 %vm80_vm0, %v49_v13 }
   0xd   :  { %1215 = vmatprep.mubr.msk.f32.mxu0 %vm80_vm0, %v18_v7  ;;  %1263 = vmatprep.mubr.msk.f32.mxu1 %vm80_vm0, %v50_v14 }
  0x10   :  { %1216 = vmatmul.mubr.msk.f32.gmra.mrb[4].mxu0 %vm80_vm0, %v19_v10  ;;  %1264 = vmatmul.mubr.msk.f32.gmra.mrb[4].mxu1 %vm80_vm0, %v51_v17 }
  0x11   :  { %1218 = vmatprep.mubr.msk.f32.mxu0 %vm80_vm0, %v20_v12  ;;  %1266 = vmatprep.mubr.msk.f32.mxu1 %vm80_vm0, %v52_v18 }
  0x14   :  { %1219 = vmatmul.mubr.msk.f32.gmra.mrb[6].mxu0 %vm80_vm0, %v21_v15 }
  0x15   :  { %1221 = vmatprep.mubr.msk.f32.mxu0 %vm80_vm0, %v22_v16 }
  0x16   :  { %9 = vsyncpa [#allocation3], 0  ;;  %v54_v22 = vld [vmem:[%s2207_s0 + $0x140] sm:$0xff]  ;;  %v25_v23 = vld [vmem:[%s2207_s0 + $0x58] sm:$0xff]  ;;  %1267 = vmatmul.mubr.msk.f32.gmra.mrb[6].mxu1 %vm80_vm0, %v53_v21  ;;  %vm658_vm1 = vcmask 261120   ;;  %vm1053_vm2 = vcmask 1040384  }
  0x17   :  { %v26_v24 = vld [vmem:[%s2207_s0 + $0x60] sm:$0xff]  ;;  %1269 = vmatprep.mubr.msk.f32.mxu1 %vm80_vm0, %v54_v22  ;;  %v55_v25 = vld [vmem:[%s2207_s0 + $0x148] sm:$0xff]  ;;  %v56_v26 = vld [vmem:[%s2207_s0 + $0x150] sm:$0xff]  ;;  %vm1055_vm3 = vcmask 254976  }
  0x18   :  { %1222 = vmatmul.mubr.msk.f32.gmra.mrb[8].mxu0 %vm80_vm0, %v23_v19  ;;  %v27_v27 = vld [vmem:[%s2207_s0 + $0x68] sm:$0xff]  ;;  %v28_v28 = vld [vmem:[%s2207_s0 + $0x70] sm:$0xff]  ;;  %v57_v29 = vld [vmem:[%s2207_s0 + $0x158] sm:$0xff] }
  0x19   :  { %1224 = vmatprep.mubr.msk.f32.mxu0 %vm80_vm0, %v24_v20  ;;  %v58_v30 = vld [vmem:[%s2207_s0 + $0x160] sm:$0xff]  ;;  %v29_v31 = vld [vmem:[%s2207_s0 + $0x78] sm:$0xff]  ;;  %v59_v33 = vld [vmem:[%s2207_s0 + $0x168] sm:$0xff] }
  0x1a   :  { %1270 = vmatmul.mubr.msk.f32.gmra.mrb[8].mxu1 %vm80_vm0, %v55_v25  ;;  %v30_v32 = vld [vmem:[%s2207_s0 + $0x80] sm:$0xff]  ;;  %v60_v34 = vld [vmem:[%s2207_s0 + $0x170] sm:$0xff]  ;;  %v31_v35 = vld [vmem:[%s2207_s0 + $0x88] sm:$0xff] }
  0x1b   :  { %1272 = vmatprep.mubr.msk.f32.mxu1 %vm80_vm0, %v56_v26  ;;  %v32_v36 = vld [vmem:[%s2207_s0 + $0x90] sm:$0xff]  ;;  %v61_v37 = vld [vmem:[%s2207_s0 + $0x178] sm:$0xff]  ;;  %v62_v38 = vld [vmem:[%s2207_s0 + $0x180] sm:$0xff] }
  0x1c   :  { %1225 = vmatmul.mubr.msk.f32.gmra.mrb[10].mxu0 %vm80_vm0, %v25_v23  ;;  %v33_v39 = vld [vmem:[%s2207_s0 + $0x98] sm:$0xff]  ;;  %v34_v40 = vld [vmem:[%s2207_s0 + $0xa0] sm:$0xff]  ;;  %v63_v41 = vld [vmem:[%s2207_s0 + $0x188] sm:$0xff] }
  0x1d   :  { %1227 = vmatprep.mubr.msk.f32.mxu0 %vm80_vm0, %v26_v24  ;;  %v64_v42 = vld [vmem:[%s2207_s0 + $0x190] sm:$0xff]  ;;  %v35_v43 = vld [vmem:[%s2207_s0 + $0xa8] sm:$0xff]  ;;  %v65_v45 = vld [vmem:[%s2207_s0 + $0x198] sm:$0xff] }
  0x1e   :  { %1273 = vmatmul.mubr.msk.f32.gmra.mrb[10].mxu1 %vm80_vm0, %v57_v29  ;;  %v36_v44 = vld [vmem:[%s2207_s0 + $0xb0] sm:$0xff]  ;;  %v66_v46 = vld [vmem:[%s2207_s0 + $0x1a0] sm:$0xff]  ;;  %v37_v47 = vld [vmem:[%s2207_s0 + $0xb8] sm:$0xff] }
  0x1f   :  { %1275 = vmatprep.mubr.msk.f32.mxu1 %vm80_vm0, %v58_v30  ;;  %v38_v48 = vld [vmem:[%s2207_s0 + $0xc0] sm:$0xff]  ;;  %v67_v49 = vld [vmem:[%s2207_s0 + $0x1a8] sm:$0xff]  ;;  %v68_v50 = vld [vmem:[%s2207_s0 + $0x1b0] sm:$0xff] }
  0x20   :  { %1228 = vmatmul.mubr.msk.f32.gmra.mrb[12].mxu0 %vm80_vm0, %v27_v27  ;;  %v39_v51 = vld [vmem:[%s2207_s0 + $0xc8] sm:$0xff]  ;;  %v40_v52 = vld [vmem:[%s2207_s0 + $0xd0] sm:$0xff]  ;;  %v69_v53 = vld [vmem:[%s2207_s0 + $0x1b8] sm:$0xff] }
  0x21   :  { %1230 = vmatprep.mubr.msk.f32.mxu0 %vm80_vm0, %v28_v28  ;;  %v70_v54 = vld [vmem:[%s2207_s0 + $0x1c0] sm:$0xff]  ;;  %v41_v55 = vld [vmem:[%s2207_s0 + $0xd8] sm:$0xff]  ;;  %v71_v57 = vld [vmem:[%s2207_s0 + $0x1c8] sm:$0xff] }
  0x22   :  { %1276 = vmatmul.mubr.msk.f32.gmra.mrb[12].mxu1 %vm80_vm0, %v59_v33  ;;  %v42_v56 = vld [vmem:[%s2207_s0 + $0xe0] sm:$0xff]  ;;  %v72_v58 = vld [vmem:[%s2207_s0 + $0x1d0] sm:$0xff]  ;;  %v43_v59 = vld [vmem:[%s2207_s0 + $0xe8] sm:$0xff] }
  0x23   :  { %1278 = vmatprep.mubr.msk.f32.mxu1 %vm80_vm0, %v60_v34  ;;  %v44_v60 = vld [vmem:[%s2207_s0 + $0xf0] sm:$0xff]  ;;  %v73_v61 = vld [vmem:[%s2207_s0 + $0x1d8] sm:$0xff]  ;;  %v74_v62 = vld [vmem:[%s2207_s0 + $0x1e0] sm:$0xff] }
  0x24   :  { %1231 = vmatmul.mubr.msk.f32.gmra.mrb[14].mxu0 %vm80_vm0, %v29_v31  ;;  %v45_v63 = vld [vmem:[%s2207_s0 + $0xf8] sm:$0xff]  ;;  %v75_v0 = vld [vmem:[%s2207_s0 + $0x1e8] sm:$0xff]  ;;  %v76_v1 = vld [vmem:[%s2207_s0 + $0x1f0] sm:$0xff] }
  0x25   :  { %1233 = vmatprep.mubr.msk.f32.mxu0 %vm80_vm0, %v30_v32  ;;  %v77_v2 = vld [vmem:[%s2207_s0 + $0x1f8] sm:$0xff] }
  0x26   :  { %1279 = vmatmul.mubr.msk.f32.gmra.mrb[14].mxu1 %vm80_vm0, %v61_v37 }
  0x27   :  { %1281 = vmatprep.mubr.msk.f32.mxu1 %vm80_vm0, %v62_v38 }
  0x28   :  { %1234 = vmatmul.mubr.msk.f32.gmra.mrb[16].mxu0 %vm80_vm0, %v31_v35 }
  0x29   :  { %1236 = vmatprep.mubr.msk.f32.mxu0 %vm80_vm0, %v32_v36 }
  0x2a   :  { %1282 = vmatmul.mubr.msk.f32.gmra.mrb[16].mxu1 %vm80_vm0, %v63_v41 }
  0x2b   :  { %1284 = vmatprep.mubr.msk.f32.mxu1 %vm80_vm0, %v64_v42 }
  0x2c   :  { %1237 = vmatmul.mubr.msk.f32.gmra.mrb[18].mxu0 %vm80_vm0, %v33_v39 }
  0x2d   :  { %1239 = vmatprep.mubr.msk.f32.mxu0 %vm80_vm0, %v34_v40 }
  0x2e   :  { %1285 = vmatmul.mubr.msk.f32.gmra.mrb[18].mxu1 %vm80_vm0, %v65_v45 }
  0x2f   :  { %1287 = vmatprep.mubr.msk.f32.mxu1 %vm80_vm0, %v66_v46 }
  0x30   :  { %1240 = vmatmul.mubr.msk.f32.gmra.mrb[20].mxu0 %vm80_vm0, %v35_v43 }
  0x31   :  { %1242 = vmatprep.mubr.msk.f32.mxu0 %vm80_vm0, %v36_v44 }
  0x32   :  { %1288 = vmatmul.mubr.msk.f32.gmra.mrb[20].mxu1 %vm80_vm0, %v67_v49 }
  0x33   :  { %1290 = vmatprep.mubr.msk.f32.mxu1 %vm80_vm0, %v68_v50 }
  0x34   :  { %1243 = vmatmul.mubr.msk.f32.gmra.mrb[22].mxu0 %vm80_vm0, %v37_v47 }
  0x35   :  { %1245 = vmatprep.mubr.msk.f32.mxu0 %vm80_vm0, %v38_v48 }
  0x36   :  { %1291 = vmatmul.mubr.msk.f32.gmra.mrb[22].mxu1 %vm80_vm0, %v69_v53 }
  0x37   :  { %1293 = vmatprep.mubr.msk.f32.mxu1 %vm80_vm0, %v70_v54 }
  0x38   :  { %1246 = vmatmul.mubr.msk.f32.gmra.mrb[24].mxu0 %vm80_vm0, %v39_v51 }
  0x39   :  { %1248 = vmatprep.mubr.msk.f32.mxu0 %vm80_vm0, %v40_v52 }
  0x3a   :  { %1294 = vmatmul.mubr.msk.f32.gmra.mrb[24].mxu1 %vm80_vm0, %v71_v57 }
  0x3b   :  { %1296 = vmatprep.mubr.msk.f32.mxu1 %vm80_vm0, %v72_v58 }
  0x3c   :  { %1249 = vmatmul.mubr.msk.f32.gmra.mrb[26].mxu0 %vm80_vm0, %v41_v55 }
  0x3d   :  { %1251 = vmatprep.mubr.msk.f32.mxu0 %vm80_vm0, %v42_v56 }
  0x3e   :  { %1297 = vmatmul.mubr.msk.f32.gmra.mrb[26].mxu1 %vm80_vm0, %v73_v61 }
  0x3f   :  { %1299 = vmatprep.mubr.msk.f32.mxu1 %vm80_vm0, %v74_v62 }
  0x40   :  { %1252 = vmatmul.mubr.msk.f32.gmra.mrb[28].mxu0 %vm80_vm0, %v43_v59 }
  0x41   :  { %1254 = vmatprep.mubr.msk.f32.mxu0 %vm80_vm0, %v44_v60 }
  0x42   :  { %1300 = vmatmul.mubr.msk.f32.gmra.mrb[28].mxu1 %vm80_vm0, %v75_v0 }
  0x43   :  { %1302 = vmatprep.mubr.msk.f32.mxu1 %vm80_vm0, %v76_v1 }
  0x44   :  { %1255 = vmatmul.mubr.msk.f32.gmra.mrb[30].mxu0 %vm80_vm0, %v45_v63 }
  0x46   :  { %1303 = vmatmul.mubr.msk.f32.gmra.mrb[30].mxu1 %vm80_vm0, %v77_v2 }
  0xdb   :  { %v1211_v3 = vpop.f32.mrb[0].mxu0  ;;  %v1640_v18 = vpop.f32.mrb[0].mxu1 }
  0xdc   :  { %660 = vst.msk [vmem:[%s2209_s2 + $0x8] sm:$0xff] %vm658_vm1, %v1211_v3  ;;  %v724_v4 = vsel %vm658_vm1, %v1211_v3, 0.0  ;;  %v857_v5 = vmul.f32 %v1211_v3, %v1211_v3  ;;  %v339_v6 = vpop.f32.mrb[1].mxu0  ;;  %692 = vst.msk [vmem:[%s2209_s2 + $0x108] sm:$0xff] %vm658_vm1, %v1640_v18  ;;  %v1647_v20 = vpop.f32.mrb[1].mxu1 }
  0xdd   :  { %659 = vst.msk [vmem:[%s2209_s2] sm:$0xff] %vm658_vm1, %v339_v6  ;;  %v723_v7 = vsel %vm658_vm1, %v339_v6, 0.0  ;;  %v856_v8 = vmul.f32 %v339_v6, %v339_v6  ;;  %691 = vst.msk [vmem:[%s2209_s2 + $0x100] sm:$0xff] %vm658_vm1, %v1647_v20 }
  0xde   :  { %v921_v9 = vsel %vm658_vm1, %v857_v5, 0.0  ;;  %v725_v10 = vadd.f32 %v724_v4, %v723_v7 }
  0xdf   :  { %v920_v11 = vsel %vm658_vm1, %v856_v8, 0.0  ;;  %v1214_v12 = vpop.f32.mrb[2].mxu0  ;;  %v1666_v31 = vpop.f32.mrb[2].mxu1 }
  0xe0   :  { %v922_v13 = vadd.f32 %v921_v9, %v920_v11  ;;  %662 = vst.msk [vmem:[%s2209_s2 + $0x18] sm:$0xff] %vm658_vm1, %v1214_v12  ;;  %v349_v14 = vpop.f32.mrb[3].mxu0  ;;  %v859_v15 = vmul.f32 %v1214_v12, %v1214_v12  ;;  %v728_v21 = vsel %vm658_vm1, %v1214_v12, 0.0  ;;  %694 = vst.msk [vmem:[%s2209_s2 + $0x118] sm:$0xff] %vm658_vm1, %v1666_v31  ;;  %v1673_v34 = vpop.f32.mrb[3].mxu1 }
  0xe1   :  { %661 = vst.msk [vmem:[%s2209_s2 + $0x10] sm:$0xff] %vm658_vm1, %v349_v14  ;;  %v726_v16 = vsel %vm658_vm1, %v349_v14, 0.0  ;;  %v858_v17 = vmul.f32 %v349_v14, %v349_v14  ;;  %693 = vst.msk [vmem:[%s2209_s2 + $0x110] sm:$0xff] %vm658_vm1, %v1673_v34 }
  0xe2   :  { %v727_v19 = vadd.f32 %v726_v16, %v725_v10  ;;  %v925_v27 = vsel %vm658_vm1, %v859_v15, 0.0 }
  0xe3   :  { %v923_v22 = vsel %vm658_vm1, %v858_v17, 0.0  ;;  %v1217_v23 = vpop.f32.mrb[4].mxu0  ;;  %v1692_v45 = vpop.f32.mrb[4].mxu1 }
  0xe4   :  { %v924_v24 = vadd.f32 %v923_v22, %v922_v13  ;;  %664 = vst.msk [vmem:[%s2209_s2 + $0x28] sm:$0xff] %vm658_vm1, %v1217_v23  ;;  %v359_v25 = vpop.f32.mrb[5].mxu0  ;;  %v729_v26 = vadd.f32 %v728_v21, %v727_v19  ;;  %v861_v28 = vmul.f32 %v1217_v23, %v1217_v23  ;;  %v732_v35 = vsel %vm658_vm1, %v1217_v23, 0.0  ;;  %696 = vst.msk [vmem:[%s2209_s2 + $0x128] sm:$0xff] %vm658_vm1, %v1692_v45  ;;  %v1699_v48 = vpop.f32.mrb[5].mxu1 }
  0xe5   :  { %663 = vst.msk [vmem:[%s2209_s2 + $0x20] sm:$0xff] %vm658_vm1, %v359_v25  ;;  %v730_v29 = vsel %vm658_vm1, %v359_v25, 0.0  ;;  %v860_v30 = vmul.f32 %v359_v25, %v359_v25  ;;  %695 = vst.msk [vmem:[%s2209_s2 + $0x120] sm:$0xff] %vm658_vm1, %v1699_v48 }
  0xe6   :  { %v731_v32 = vadd.f32 %v730_v29, %v729_v26  ;;  %v926_v33 = vadd.f32 %v925_v27, %v924_v24  ;;  %v929_v41 = vsel %vm658_vm1, %v861_v28, 0.0 }
  0xe7   :  { %v927_v36 = vsel %vm658_vm1, %v860_v30, 0.0  ;;  %v1220_v37 = vpop.f32.mrb[6].mxu0 }
  0xe8   :  { %v928_v38 = vadd.f32 %v927_v36, %v926_v33  ;;  %666 = vst.msk [vmem:[%s2209_s2 + $0x38] sm:$0xff] %vm658_vm1, %v1220_v37  ;;  %v369_v39 = vpop.f32.mrb[7].mxu0  ;;  %v733_v40 = vadd.f32 %v732_v35, %v731_v32  ;;  %v863_v42 = vmul.f32 %v1220_v37, %v1220_v37  ;;  %v736_v49 = vsel %vm658_vm1, %v1220_v37, 0.0 }
  0xe9   :  { %665 = vst.msk [vmem:[%s2209_s2 + $0x30] sm:$0xff] %vm658_vm1, %v369_v39  ;;  %v734_v43 = vsel %vm658_vm1, %v369_v39, 0.0  ;;  %v862_v44 = vmul.f32 %v369_v39, %v369_v39  ;;  %v1718_v59 = vpop.f32.mrb[6].mxu1 }
  0xea   :  { %v735_v46 = vadd.f32 %v734_v43, %v733_v40  ;;  %v930_v47 = vadd.f32 %v929_v41, %v928_v38  ;;  %v933_v55 = vsel %vm658_vm1, %v863_v42, 0.0  ;;  %698 = vst.msk [vmem:[%s2209_s2 + $0x138] sm:$0xff] %vm658_vm1, %v1718_v59  ;;  %v1725_v62 = vpop.f32.mrb[7].mxu1 }
  0xeb   :  { %v931_v50 = vsel %vm658_vm1, %v862_v44, 0.0  ;;  %v1223_v51 = vpop.f32.mrb[8].mxu0  ;;  %697 = vst.msk [vmem:[%s2209_s2 + $0x130] sm:$0xff] %vm658_vm1, %v1725_v62 }
  0xec   :  { %v932_v52 = vadd.f32 %v931_v50, %v930_v47  ;;  %668 = vst.msk [vmem:[%s2209_s2 + $0x48] sm:$0xff] %vm658_vm1, %v1223_v51  ;;  %v379_v53 = vpop.f32.mrb[9].mxu0  ;;  %v737_v54 = vadd.f32 %v736_v49, %v735_v46  ;;  %v865_v56 = vmul.f32 %v1223_v51, %v1223_v51  ;;  %v740_v63 = vsel %vm658_vm1, %v1223_v51, 0.0 }
  0xed   :  { %667 = vst.msk [vmem:[%s2209_s2 + $0x40] sm:$0xff] %vm658_vm1, %v379_v53  ;;  %v738_v57 = vsel %vm658_vm1, %v379_v53, 0.0  ;;  %v864_v58 = vmul.f32 %v379_v53, %v379_v53  ;;  %v1744_v9 = vpop.f32.mrb[8].mxu1 }
  0xee   :  { %v739_v60 = vadd.f32 %v738_v57, %v737_v54  ;;  %v934_v61 = vadd.f32 %v933_v55, %v932_v52  ;;  %v937_v5 = vsel %vm658_vm1, %v865_v56, 0.0  ;;  %700 = vst.msk [vmem:[%s2209_s2 + $0x148] sm:$0xff] %vm658_vm1, %v1744_v9  ;;  %v1751_v12 = vpop.f32.mrb[9].mxu1 }
  0xef   :  { %v935_v0 = vsel %vm658_vm1, %v864_v58, 0.0  ;;  %v1226_v1 = vpop.f32.mrb[10].mxu0  ;;  %699 = vst.msk [vmem:[%s2209_s2 + $0x140] sm:$0xff] %vm658_vm1, %v1751_v12 }
  0xf0   :  { %v936_v2 = vadd.f32 %v935_v0, %v934_v61  ;;  %670 = vst.msk [vmem:[%s2209_s2 + $0x58] sm:$0xff] %vm658_vm1, %v1226_v1  ;;  %v389_v3 = vpop.f32.mrb[11].mxu0  ;;  %v741_v4 = vadd.f32 %v740_v63, %v739_v60  ;;  %v867_v6 = vmul.f32 %v1226_v1, %v1226_v1  ;;  %v744_v13 = vsel %vm658_vm1, %v1226_v1, 0.0 }
  0xf1   :  { %669 = vst.msk [vmem:[%s2209_s2 + $0x50] sm:$0xff] %vm658_vm1, %v389_v3  ;;  %v742_v7 = vsel %vm658_vm1, %v389_v3, 0.0  ;;  %v866_v8 = vmul.f32 %v389_v3, %v389_v3  ;;  %v1770_v25 = vpop.f32.mrb[10].mxu1 }
  0xf2   :  { %v743_v10 = vadd.f32 %v742_v7, %v741_v4  ;;  %v938_v11 = vadd.f32 %v937_v5, %v936_v2  ;;  %v941_v21 = vsel %vm658_vm1, %v867_v6, 0.0  ;;  %702 = vst.msk [vmem:[%s2209_s2 + $0x158] sm:$0xff] %vm658_vm1, %v1770_v25  ;;  %v1777_v28 = vpop.f32.mrb[11].mxu1 }
  0xf3   :  { %v939_v14 = vsel %vm658_vm1, %v866_v8, 0.0  ;;  %v1229_v15 = vpop.f32.mrb[12].mxu0  ;;  %701 = vst.msk [vmem:[%s2209_s2 + $0x150] sm:$0xff] %vm658_vm1, %v1777_v28 }
  0xf4   :  { %v940_v16 = vadd.f32 %v939_v14, %v938_v11  ;;  %672 = vst.msk [vmem:[%s2209_s2 + $0x68] sm:$0xff] %vm658_vm1, %v1229_v15  ;;  %v399_v17 = vpop.f32.mrb[13].mxu0  ;;  %v745_v19 = vadd.f32 %v744_v13, %v743_v10  ;;  %v869_v22 = vmul.f32 %v1229_v15, %v1229_v15  ;;  %v748_v29 = vsel %vm658_vm1, %v1229_v15, 0.0 }
  0xf5   :  { %671 = vst.msk [vmem:[%s2209_s2 + $0x60] sm:$0xff] %vm658_vm1, %v399_v17  ;;  %v746_v23 = vsel %vm658_vm1, %v399_v17, 0.0  ;;  %v868_v24 = vmul.f32 %v399_v17, %v399_v17  ;;  %v1796_v41 = vpop.f32.mrb[12].mxu1 }
  0xf6   :  { %v747_v26 = vadd.f32 %v746_v23, %v745_v19  ;;  %v942_v27 = vadd.f32 %v941_v21, %v940_v16  ;;  %v945_v37 = vsel %vm658_vm1, %v869_v22, 0.0  ;;  %704 = vst.msk [vmem:[%s2209_s2 + $0x168] sm:$0xff] %vm658_vm1, %v1796_v41  ;;  %v1803_v44 = vpop.f32.mrb[13].mxu1 }
  0xf7   :  { %v943_v30 = vsel %vm658_vm1, %v868_v24, 0.0  ;;  %v1232_v32 = vpop.f32.mrb[14].mxu0  ;;  %703 = vst.msk [vmem:[%s2209_s2 + $0x160] sm:$0xff] %vm658_vm1, %v1803_v44 }
  0xf8   :  { %v944_v33 = vadd.f32 %v943_v30, %v942_v27  ;;  %674 = vst.msk [vmem:[%s2209_s2 + $0x78] sm:$0xff] %vm658_vm1, %v1232_v32  ;;  %v409_v35 = vpop.f32.mrb[15].mxu0  ;;  %v749_v36 = vadd.f32 %v748_v29, %v747_v26  ;;  %v871_v38 = vmul.f32 %v1232_v32, %v1232_v32  ;;  %v752_v46 = vsel %vm658_vm1, %v1232_v32, 0.0 }
  0xf9   :  { %673 = vst.msk [vmem:[%s2209_s2 + $0x70] sm:$0xff] %vm658_vm1, %v409_v35  ;;  %v750_v39 = vsel %vm658_vm1, %v409_v35, 0.0  ;;  %v870_v40 = vmul.f32 %v409_v35, %v409_v35  ;;  %v1822_v57 = vpop.f32.mrb[14].mxu1 }
  0xfa   :  { %v751_v42 = vadd.f32 %v750_v39, %v749_v36  ;;  %v946_v43 = vadd.f32 %v945_v37, %v944_v33  ;;  %v949_v53 = vsel %vm658_vm1, %v871_v38, 0.0  ;;  %706 = vst.msk [vmem:[%s2209_s2 + $0x178] sm:$0xff] %vm658_vm1, %v1822_v57  ;;  %v1829_v61 = vpop.f32.mrb[15].mxu1 }
  0xfb   :  { %v947_v47 = vsel %vm658_vm1, %v870_v40, 0.0  ;;  %v1235_v49 = vpop.f32.mrb[16].mxu0  ;;  %705 = vst.msk [vmem:[%s2209_s2 + $0x170] sm:$0xff] %vm658_vm1, %v1829_v61 }
  0xfc   :  { %v948_v50 = vadd.f32 %v947_v47, %v946_v43  ;;  %676 = vst.msk [vmem:[%s2209_s2 + $0x88] sm:$0xff] %vm658_vm1, %v1235_v49  ;;  %v419_v51 = vpop.f32.mrb[17].mxu0  ;;  %v753_v52 = vadd.f32 %v752_v46, %v751_v42  ;;  %v873_v54 = vmul.f32 %v1235_v49, %v1235_v49  ;;  %v756_v63 = vsel %vm658_vm1, %v1235_v49, 0.0 }
  0xfd   :  { %675 = vst.msk [vmem:[%s2209_s2 + $0x80] sm:$0xff] %vm658_vm1, %v419_v51  ;;  %v754_v55 = vsel %vm658_vm1, %v419_v51, 0.0  ;;  %v872_v56 = vmul.f32 %v419_v51, %v419_v51  ;;  %v1848_v10 = vpop.f32.mrb[16].mxu1 }
  0xfe   :  { %v755_v58 = vadd.f32 %v754_v55, %v753_v52  ;;  %v950_v60 = vadd.f32 %v949_v53, %v948_v50  ;;  %v953_v5 = vsel %vm658_vm1, %v873_v54, 0.0  ;;  %708 = vst.msk [vmem:[%s2209_s2 + $0x188] sm:$0xff] %vm658_vm1, %v1848_v10  ;;  %v1855_v14 = vpop.f32.mrb[17].mxu1 }
  0xff   :  { %v951_v0 = vsel %vm658_vm1, %v872_v56, 0.0  ;;  %v1238_v1 = vpop.f32.mrb[18].mxu0  ;;  %707 = vst.msk [vmem:[%s2209_s2 + $0x180] sm:$0xff] %vm658_vm1, %v1855_v14 }
 0x100   :  { %v952_v2 = vadd.f32 %v951_v0, %v950_v60  ;;  %678 = vst.msk [vmem:[%s2209_s2 + $0x98] sm:$0xff] %vm658_vm1, %v1238_v1  ;;  %v429_v3 = vpop.f32.mrb[19].mxu0  ;;  %v757_v4 = vadd.f32 %v756_v63, %v755_v58  ;;  %v875_v6 = vmul.f32 %v1238_v1, %v1238_v1  ;;  %v760_v15 = vsel %vm658_vm1, %v1238_v1, 0.0 }
 0x101   :  { %677 = vst.msk [vmem:[%s2209_s2 + $0x90] sm:$0xff] %vm658_vm1, %v429_v3  ;;  %v758_v7 = vsel %vm658_vm1, %v429_v3, 0.0  ;;  %v874_v8 = vmul.f32 %v429_v3, %v429_v3  ;;  %v1874_v29 = vpop.f32.mrb[18].mxu1 }
 0x102   :  { %v759_v11 = vadd.f32 %v758_v7, %v757_v4  ;;  %v954_v13 = vadd.f32 %v953_v5, %v952_v2  ;;  %v957_v23 = vsel %vm658_vm1, %v875_v6, 0.0  ;;  %710 = vst.msk [vmem:[%s2209_s2 + $0x198] sm:$0xff] %vm658_vm1, %v1874_v29  ;;  %v1881_v33 = vpop.f32.mrb[19].mxu1 }
 0x103   :  { %v955_v16 = vsel %vm658_vm1, %v874_v8, 0.0  ;;  %v1241_v17 = vpop.f32.mrb[20].mxu0  ;;  %709 = vst.msk [vmem:[%s2209_s2 + $0x190] sm:$0xff] %vm658_vm1, %v1881_v33 }
 0x104   :  { %v956_v19 = vadd.f32 %v955_v16, %v954_v13  ;;  %680 = vst.msk [vmem:[%s2209_s2 + $0xa8] sm:$0xff] %vm658_vm1, %v1241_v17  ;;  %v439_v21 = vpop.f32.mrb[21].mxu0  ;;  %v761_v22 = vadd.f32 %v760_v15, %v759_v11  ;;  %v877_v24 = vmul.f32 %v1241_v17, %v1241_v17  ;;  %v764_v35 = vsel %vm658_vm1, %v1241_v17, 0.0 }
 0x105   :  { %679 = vst.msk [vmem:[%s2209_s2 + $0xa0] sm:$0xff] %vm658_vm1, %v439_v21  ;;  %v762_v26 = vsel %vm658_vm1, %v439_v21, 0.0  ;;  %v876_v27 = vmul.f32 %v439_v21, %v439_v21  ;;  %v1900_v49 = vpop.f32.mrb[20].mxu1 }
 0x106   :  { %v763_v30 = vadd.f32 %v762_v26, %v761_v22  ;;  %v958_v32 = vadd.f32 %v957_v23, %v956_v19  ;;  %v961_v42 = vsel %vm658_vm1, %v877_v24, 0.0  ;;  %712 = vst.msk [vmem:[%s2209_s2 + $0x1a8] sm:$0xff] %vm658_vm1, %v1900_v49  ;;  %v1907_v52 = vpop.f32.mrb[21].mxu1 }
 0x107   :  { %v959_v36 = vsel %vm658_vm1, %v876_v27, 0.0  ;;  %v1244_v37 = vpop.f32.mrb[22].mxu0  ;;  %711 = vst.msk [vmem:[%s2209_s2 + $0x1a0] sm:$0xff] %vm658_vm1, %v1907_v52 }
 0x108   :  { %v960_v38 = vadd.f32 %v959_v36, %v958_v32  ;;  %682 = vst.msk [vmem:[%s2209_s2 + $0xb8] sm:$0xff] %vm658_vm1, %v1244_v37  ;;  %v449_v39 = vpop.f32.mrb[23].mxu0  ;;  %v765_v40 = vadd.f32 %v764_v35, %v763_v30  ;;  %v879_v43 = vmul.f32 %v1244_v37, %v1244_v37  ;;  %v768_v53 = vsel %vm658_vm1, %v1244_v37, 0.0 }
 0x109   :  { %681 = vst.msk [vmem:[%s2209_s2 + $0xb0] sm:$0xff] %vm658_vm1, %v449_v39  ;;  %v766_v46 = vsel %vm658_vm1, %v449_v39, 0.0  ;;  %v878_v47 = vmul.f32 %v449_v39, %v449_v39  ;;  %v1926_v3 = vpop.f32.mrb[22].mxu1 }
 0x10a   :  { %v767_v50 = vadd.f32 %v766_v46, %v765_v40  ;;  %v962_v51 = vadd.f32 %v961_v42, %v960_v38  ;;  %v965_v63 = vsel %vm658_vm1, %v879_v43, 0.0  ;;  %714 = vst.msk [vmem:[%s2209_s2 + $0x1b8] sm:$0xff] %vm658_vm1, %v1926_v3  ;;  %v1933_v6 = vpop.f32.mrb[23].mxu1 }
 0x10b   :  { %v963_v54 = vsel %vm658_vm1, %v878_v47, 0.0  ;;  %v1247_v55 = vpop.f32.mrb[24].mxu0  ;;  %713 = vst.msk [vmem:[%s2209_s2 + $0x1b0] sm:$0xff] %vm658_vm1, %v1933_v6 }
 0x10c   :  { %v964_v56 = vadd.f32 %v963_v54, %v962_v51  ;;  %684 = vst.msk [vmem:[%s2209_s2 + $0xc8] sm:$0xff] %vm658_vm1, %v1247_v55  ;;  %v459_v58 = vpop.f32.mrb[25].mxu0  ;;  %v769_v60 = vadd.f32 %v768_v53, %v767_v50  ;;  %v881_v0 = vmul.f32 %v1247_v55, %v1247_v55  ;;  %v772_v7 = vsel %vm658_vm1, %v1247_v55, 0.0 }
 0x10d   :  { %683 = vst.msk [vmem:[%s2209_s2 + $0xc0] sm:$0xff] %vm658_vm1, %v459_v58  ;;  %v770_v1 = vsel %vm658_vm1, %v459_v58, 0.0  ;;  %v880_v2 = vmul.f32 %v459_v58, %v459_v58  ;;  %v1952_v23 = vpop.f32.mrb[24].mxu1 }
 0x10e   :  { %v771_v4 = vadd.f32 %v770_v1, %v769_v60  ;;  %v966_v5 = vadd.f32 %v965_v63, %v964_v56  ;;  %v969_v17 = vsel %vm658_vm1, %v881_v0, 0.0  ;;  %716 = vst.msk [vmem:[%s2209_s2 + $0x1c8] sm:$0xff] %vm658_vm1, %v1952_v23  ;;  %v1959_v27 = vpop.f32.mrb[25].mxu1  ;;  %v888_v63 = vmul.f32 %v1647_v20, %v1647_v20 }
 0x10f   :  { %v967_v8 = vsel %vm658_vm1, %v880_v2, 0.0  ;;  %v1250_v11 = vpop.f32.mrb[26].mxu0  ;;  %715 = vst.msk [vmem:[%s2209_s2 + $0x1c0] sm:$0xff] %vm658_vm1, %v1959_v27 }
 0x110   :  { %v968_v13 = vadd.f32 %v967_v8, %v966_v5  ;;  %686 = vst.msk [vmem:[%s2209_s2 + $0xd8] sm:$0xff] %vm658_vm1, %v1250_v11  ;;  %v469_v15 = vpop.f32.mrb[27].mxu0  ;;  %v773_v16 = vadd.f32 %v772_v7, %v771_v4  ;;  %v883_v19 = vmul.f32 %v1250_v11, %v1250_v11  ;;  %v776_v30 = vsel %vm658_vm1, %v1250_v11, 0.0 }
 0x111   :  { %685 = vst.msk [vmem:[%s2209_s2 + $0xd0] sm:$0xff] %vm658_vm1, %v469_v15  ;;  %v774_v21 = vsel %vm658_vm1, %v469_v15, 0.0  ;;  %v882_v22 = vmul.f32 %v469_v15, %v469_v15  ;;  %v1978_v46 = vpop.f32.mrb[26].mxu1 }
 0x112   :  { %v775_v24 = vadd.f32 %v774_v21, %v773_v16  ;;  %v970_v26 = vadd.f32 %v969_v17, %v968_v13  ;;  %v973_v39 = vsel %vm658_vm1, %v883_v19, 0.0  ;;  %718 = vst.msk [vmem:[%s2209_s2 + $0x1d8] sm:$0xff] %vm658_vm1, %v1978_v46  ;;  %v1985_v51 = vpop.f32.mrb[27].mxu1  ;;  %v786_v16 = vsel %vm658_vm1, %v1647_v20, 0.0 }
 0x113   :  { %v971_v32 = vsel %vm658_vm1, %v882_v22, 0.0  ;;  %v1253_v35 = vpop.f32.mrb[28].mxu0  ;;  %717 = vst.msk [vmem:[%s2209_s2 + $0x1d0] sm:$0xff] %vm658_vm1, %v1985_v51  ;;  %v889_v22 = vmul.f32 %v1640_v18, %v1640_v18 }
 0x114   :  { %v972_v36 = vadd.f32 %v971_v32, %v970_v26  ;;  %688 = vst.msk [vmem:[%s2209_s2 + $0xe8] sm:$0xff] %vm658_vm1, %v1253_v35  ;;  %v479_v37 = vpop.f32.mrb[29].mxu0  ;;  %v777_v38 = vadd.f32 %v776_v30, %v775_v24  ;;  %v885_v40 = vmul.f32 %v1253_v35, %v1253_v35  ;;  %v780_v53 = vsel %vm658_vm1, %v1253_v35, 0.0 }
 0x115   :  { %687 = vst.msk [vmem:[%s2209_s2 + $0xe0] sm:$0xff] %vm658_vm1, %v479_v37  ;;  %v778_v42 = vsel %vm658_vm1, %v479_v37, 0.0  ;;  %v884_v43 = vmul.f32 %v479_v37, %v479_v37  ;;  %v2006_v5 = vpop.f32.mrb[28].mxu1  ;;  %v983_v24 = vsel %vm658_vm1, %v888_v63, 0.0  ;;  %v890_v26 = vmul.f32 %v1673_v34, %v1673_v34 }
 0x116   :  { %v779_v47 = vadd.f32 %v778_v42, %v777_v38  ;;  %v974_v50 = vadd.f32 %v973_v39, %v972_v36  ;;  %v977_v0 = vsel %vm658_vm1, %v885_v40, 0.0  ;;  %720 = vst.msk [vmem:[%s2209_s2 + $0x1e8] sm:$0xff] %vm658_vm1, %v2006_v5  ;;  %v2013_v11 = vpop.f32.mrb[29].mxu1  ;;  %v788_v36 = vsel %vm658_vm1, %v1640_v18, 0.0 }
 0x117   :  { %v975_v54 = vsel %vm658_vm1, %v884_v43, 0.0  ;;  %v1256_v55 = vpop.f32.mrb[30].mxu0  ;;  %719 = vst.msk [vmem:[%s2209_s2 + $0x1e0] sm:$0xff] %vm658_vm1, %v2013_v11  ;;  %v790_v37 = vsel %vm658_vm1, %v1673_v34, 0.0  ;;  %v985_v40 = vsel %vm658_vm1, %v889_v22, 0.0  ;;  %v891_v42 = vmul.f32 %v1666_v31, %v1666_v31 }
 0x118   :  { %v976_v56 = vadd.f32 %v975_v54, %v974_v50  ;;  %690 = vst.msk [vmem:[%s2209_s2 + $0xf8] sm:$0xff] %vm658_vm1, %v1256_v55  ;;  %v489_v58 = vpop.f32.mrb[31].mxu0  ;;  %v781_v60 = vadd.f32 %v780_v53, %v779_v47  ;;  %v887_v1 = vmul.f32 %v1256_v55, %v1256_v55  ;;  %v784_v13 = vsel %vm658_vm1, %v1256_v55, 0.0 }
 0x119   :  { %689 = vst.msk [vmem:[%s2209_s2 + $0xf0] sm:$0xff] %vm658_vm1, %v489_v58  ;;  %v782_v2 = vsel %vm658_vm1, %v489_v58, 0.0  ;;  %v886_v4 = vmul.f32 %v489_v58, %v489_v58  ;;  %v2030_v30 = vpop.f32.mrb[30].mxu1  ;;  %v987_v43 = vsel %vm658_vm1, %v890_v26, 0.0  ;;  %v892_v18 = vmul.f32 %v1699_v48, %v1699_v48 }
 0x11a   :  { %v783_v7 = vadd.f32 %v782_v2, %v781_v60  ;;  %v978_v8 = vadd.f32 %v977_v0, %v976_v56  ;;  %v981_v21 = vsel %vm658_vm1, %v887_v1, 0.0  ;;  %722 = vst.msk [vmem:[%s2209_s2 + $0x1f8] sm:$0xff] %vm658_vm1, %v2030_v30  ;;  %v2037_v35 = vpop.f32.mrb[31].mxu1  ;;  %v792_v50 = vsel %vm658_vm1, %v1666_v31, 0.0 }
 0x11b   :  { %v979_v15 = vsel %vm658_vm1, %v886_v4, 0.0  ;;  %721 = vst.msk [vmem:[%s2209_s2 + $0x1f0] sm:$0xff] %vm658_vm1, %v2037_v35  ;;  %v794_v53 = vsel %vm658_vm1, %v1699_v48, 0.0  ;;  %v989_v56 = vsel %vm658_vm1, %v891_v42, 0.0  ;;  %v893_v58 = vmul.f32 %v1692_v45, %v1692_v45  ;;  %s1336_s2 = smov [#allocation2]  }
 0x11c   :  { %v785_v17 = vadd.f32 %v784_v13, %v783_v7  ;;  %v980_v19 = vadd.f32 %v979_v15, %v978_v8  ;;  %v991_v60 = vsel %vm658_vm1, %v892_v18, 0.0  ;;  %v894_v63 = vmul.f32 %v1725_v62, %v1725_v62  ;;  %s1065_s15 = sshll.u32 %s1336_s2, 4  ;;  %s1066_s15 = int_to_ptr.vmem [resolvable:$true] %s1065_s15 }
 0x11d   :  { %v796_v31 = vsel %vm658_vm1, %v1692_v45, 0.0  ;;  %v798_v48 = vsel %vm658_vm1, %v1725_v62, 0.0  ;;  %v993_v7 = vsel %vm658_vm1, %v893_v58, 0.0  ;;  %v895_v8 = vmul.f32 %v1718_v59, %v1718_v59  ;;  %s1312_s16 = scalar_lea.vmem %s1066_s15, 32  ;;  %p1317_p1 = scmp.lt.s32.totalorder %s1066_s15, %s1066_s15 }
 0x11e   :  { %v982_v20 = vadd.f32 %v981_v21, %v980_v19  ;;  %v787_v32 = vadd.f32 %v786_v16, %v785_v17  ;;  %v995_v13 = vsel %vm658_vm1, %v894_v63, 0.0  ;;  %v896_v15 = vmul.f32 %v1751_v12, %v1751_v12  ;;  %p1313_p0 = scmp.ne.s32.totalorder %s1066_s15, %s1312_s16  ;;  %p1318_p2 = scmp.lt.s32.totalorder %s1312_s16, %s1312_s16 }
 0x11f   :  { %v800_v45 = vsel %vm658_vm1, %v1718_v59, 0.0  ;;  %v802_v62 = vsel %vm658_vm1, %v1751_v12, 0.0  ;;  %v997_v22 = vsel %vm658_vm1, %v895_v8, 0.0  ;;  %v804_v59 = vsel %vm658_vm1, %v1744_v9, 0.0 }
 0x120   :  { %v984_v38 = vadd.f32 %v983_v24, %v982_v20  ;;  %v789_v39 = vadd.f32 %v788_v36, %v787_v32  ;;  %v897_v24 = vmul.f32 %v1744_v9, %v1744_v9  ;;  %v999_v26 = vsel %vm658_vm1, %v896_v15, 0.0  ;;  %p1319_p3 = por %p1318_p2, %p1317_p1 }
 0x121   :  { %v898_v20 = vmul.f32 %v1777_v28, %v1777_v28  ;;  %v806_v12 = vsel %vm658_vm1, %v1777_v28, 0.0  ;;  %v808_v9 = vsel %vm658_vm1, %v1770_v25, 0.0  ;;  %v810_v28 = vsel %vm658_vm1, %v1803_v44, 0.0 }
 0x122   :  { %v791_v47 = vadd.f32 %v790_v37, %v789_v39  ;;  %v986_v34 = vadd.f32 %v985_v40, %v984_v38  ;;  %v1001_v39 = vsel %vm658_vm1, %v897_v24, 0.0  ;;  %v899_v40 = vmul.f32 %v1770_v25, %v1770_v25  ;;  %p1320_p4 = pnand %p1319_p3, %p1313_p0 }
 0x123   :  { %v1003_v42 = vsel %vm658_vm1, %v898_v20, 0.0  ;;  %v812_v25 = vsel %vm658_vm1, %v1796_v41, 0.0 }
 0x124   :  { %v988_v54 = vadd.f32 %v987_v43, %v986_v34  ;;  %v793_v55 = vadd.f32 %v792_v50, %v791_v47  ;;  %v900_v43 = vmul.f32 %v1803_v44, %v1803_v44  ;;  %v814_v44 = vsel %vm658_vm1, %v1829_v61, 0.0 }
 0x126   :  { %v795_v0 = vadd.f32 %v794_v53, %v793_v55  ;;  %v990_v1 = vadd.f32 %v989_v56, %v988_v54  ;;  %v1005_v53 = vsel %vm658_vm1, %v899_v40, 0.0  ;;  %v901_v54 = vmul.f32 %v1796_v41, %v1796_v41 }
 0x127   :  { %v1007_v55 = vsel %vm658_vm1, %v900_v43, 0.0  ;;  %v902_v56 = vmul.f32 %v1829_v61, %v1829_v61  ;;  %v816_v41 = vsel %vm658_vm1, %v1822_v57, 0.0  ;;  %v818_v61 = vsel %vm658_vm1, %v1855_v14, 0.0 }
 0x128   :  { %v992_v2 = vadd.f32 %v991_v60, %v990_v1  ;;  %v797_v4 = vadd.f32 %v796_v31, %v795_v0  ;;  %v1009_v1 = vsel %vm658_vm1, %v901_v54, 0.0  ;;  %v903_v31 = vmul.f32 %v1822_v57, %v1822_v57 }
 0x129   :  { %v820_v57 = vsel %vm658_vm1, %v1848_v10, 0.0 }
 0x12a   :  { %v799_v16 = vadd.f32 %v798_v48, %v797_v4  ;;  %v994_v17 = vadd.f32 %v993_v7, %v992_v2  ;;  %v1011_v48 = vsel %vm658_vm1, %v902_v56, 0.0  ;;  %v904_v2 = vmul.f32 %v1855_v14, %v1855_v14 }
 0x12b   :  { %v1013_v15 = vsel %vm658_vm1, %v903_v31, 0.0  ;;  %v822_v14 = vsel %vm658_vm1, %v1881_v33, 0.0 }
 0x12c   :  { %v996_v19 = vadd.f32 %v995_v13, %v994_v17  ;;  %v801_v21 = vadd.f32 %v800_v45, %v799_v16  ;;  %v905_v16 = vmul.f32 %v1848_v10, %v1848_v10  ;;  %v1015_v17 = vsel %vm658_vm1, %v904_v2, 0.0 }
 0x12d   :  { %v906_v45 = vmul.f32 %v1881_v33, %v1881_v33  ;;  %v824_v10 = vsel %vm658_vm1, %v1874_v29, 0.0  ;;  %v826_v33 = vsel %vm658_vm1, %v1907_v52, 0.0 }
 0x12e   :  { %v803_v32 = vadd.f32 %v802_v62, %v801_v21  ;;  %v998_v36 = vadd.f32 %v997_v22, %v996_v19  ;;  %v1017_v24 = vsel %vm658_vm1, %v905_v16, 0.0 }
 0x12f   :  { %v1019_v20 = vsel %vm658_vm1, %v906_v45, 0.0 }
 0x130   :  { %v1000_v37 = vadd.f32 %v999_v26, %v998_v36  ;;  %v805_v38 = vadd.f32 %v804_v59, %v803_v32  ;;  %v907_v26 = vmul.f32 %v1874_v29, %v1874_v29  ;;  %v908_v32 = vmul.f32 %v1907_v52, %v1907_v52 }
 0x131   :  { %v828_v29 = vsel %vm658_vm1, %v1900_v49, 0.0  ;;  %v830_v52 = vsel %vm658_vm1, %v1933_v6, 0.0 }
 0x132   :  { %v807_v18 = vadd.f32 %v806_v12, %v805_v38  ;;  %v1002_v47 = vadd.f32 %v1001_v39, %v1000_v37  ;;  %v1021_v38 = vsel %vm658_vm1, %v907_v26, 0.0  ;;  %v909_v39 = vmul.f32 %v1900_v49, %v1900_v49 }
 0x133   :  { %v1023_v40 = vsel %vm658_vm1, %v908_v32, 0.0  ;;  %v832_v49 = vsel %vm658_vm1, %v1926_v3, 0.0 }
 0x134   :  { %v1004_v34 = vadd.f32 %v1003_v42, %v1002_v47  ;;  %v809_v50 = vadd.f32 %v808_v9, %v807_v18  ;;  %v910_v42 = vmul.f32 %v1933_v6, %v1933_v6  ;;  %v834_v6 = vsel %vm658_vm1, %v1959_v27, 0.0 }
 0x136   :  { %v811_v58 = vadd.f32 %v810_v28, %v809_v50  ;;  %v1006_v60 = vadd.f32 %v1005_v53, %v1004_v34  ;;  %v1025_v28 = vsel %vm658_vm1, %v909_v39, 0.0  ;;  %v911_v34 = vmul.f32 %v1926_v3, %v1926_v3 }
 0x137   :  { %v1027_v50 = vsel %vm658_vm1, %v910_v42, 0.0  ;;  %v912_v53 = vmul.f32 %v1959_v27, %v1959_v27  ;;  %v836_v3 = vsel %vm658_vm1, %v1952_v23, 0.0  ;;  %v838_v27 = vsel %vm658_vm1, %v1985_v51, 0.0 }
 0x138   :  { %v1008_v63 = vadd.f32 %v1007_v55, %v1006_v60  ;;  %v813_v0 = vadd.f32 %v812_v25, %v811_v58  ;;  %v1029_v60 = vsel %vm658_vm1, %v911_v34, 0.0  ;;  %v913_v25 = vmul.f32 %v1952_v23, %v1952_v23 }
 0x139   :  { %v840_v23 = vsel %vm658_vm1, %v1978_v46, 0.0 }
 0x13a   :  { %v815_v4 = vadd.f32 %v814_v44, %v813_v0  ;;  %v1010_v7 = vadd.f32 %v1009_v1, %v1008_v63  ;;  %v1031_v44 = vsel %vm658_vm1, %v912_v53, 0.0  ;;  %v914_v63 = vmul.f32 %v1985_v51, %v1985_v51 }
 0x13b   :  { %v1033_v2 = vsel %vm658_vm1, %v913_v25, 0.0  ;;  %v842_v51 = vsel %vm658_vm1, %v2013_v11, 0.0 }
 0x13c   :  { %v1012_v8 = vadd.f32 %v1011_v48, %v1010_v7  ;;  %v817_v13 = vadd.f32 %v816_v41, %v815_v4  ;;  %v915_v4 = vmul.f32 %v1978_v46, %v1978_v46  ;;  %v1035_v7 = vsel %vm658_vm1, %v914_v63, 0.0 }
 0x13d   :  { %v916_v41 = vmul.f32 %v2013_v11, %v2013_v11  ;;  %v844_v46 = vsel %vm658_vm1, %v2006_v5, 0.0  ;;  %v846_v11 = vsel %vm658_vm1, %v2037_v35, 0.0 }
 0x13e   :  { %v819_v62 = vadd.f32 %v818_v61, %v817_v13  ;;  %v1014_v19 = vadd.f32 %v1013_v15, %v1012_v8  ;;  %v1037_v16 = vsel %vm658_vm1, %v915_v4, 0.0 }
 0x13f   :  { %v1039_v45 = vsel %vm658_vm1, %v916_v41, 0.0 }
 0x140   :  { %v1016_v21 = vadd.f32 %v1015_v17, %v1014_v19  ;;  %v821_v22 = vadd.f32 %v820_v57, %v819_v62  ;;  %v917_v17 = vmul.f32 %v2006_v5, %v2006_v5  ;;  %v918_v62 = vmul.f32 %v2037_v35, %v2037_v35 }
 0x142   :  { %v823_v36 = vadd.f32 %v822_v14, %v821_v22  ;;  %v1018_v59 = vadd.f32 %v1017_v24, %v1016_v21  ;;  %v1041_v22 = vsel %vm658_vm1, %v917_v17, 0.0  ;;  %v919_v24 = vmul.f32 %v2030_v30, %v2030_v30 }
 0x143   :  { %v1043_v26 = vsel %vm658_vm1, %v918_v62, 0.0 }
 0x144   :  { %v1020_v12 = vadd.f32 %v1019_v20, %v1018_v59  ;;  %v825_v37 = vadd.f32 %v824_v10, %v823_v36  ;;  %v848_v36 = vsel %vm658_vm1, %v2030_v30, 0.0  ;;  %v1045_v5 = vsel %vm658_vm1, %v919_v24, 0.0 }
 0x146   :  { %v827_v43 = vadd.f32 %v826_v33, %v825_v37  ;;  %v1022_v18 = vadd.f32 %v1021_v38, %v1020_v12 }
 0x148   :  { %v1024_v47 = vadd.f32 %v1023_v40, %v1022_v18  ;;  %v829_v9 = vadd.f32 %v828_v29, %v827_v43 }
 0x14a   :  { %v831_v54 = vadd.f32 %v830_v52, %v829_v9  ;;  %v1026_v55 = vadd.f32 %v1025_v28, %v1024_v47 }
 0x14c   :  { %v1028_v56 = vadd.f32 %v1027_v50, %v1026_v55  ;;  %v833_v58 = vadd.f32 %v832_v49, %v831_v54 }
 0x14e   :  { %v835_v0 = vadd.f32 %v834_v6, %v833_v58  ;;  %v1030_v1 = vadd.f32 %v1029_v60, %v1028_v56 }
 0x150   :  { %v1032_v31 = vadd.f32 %v1031_v44, %v1030_v1  ;;  %v837_v48 = vadd.f32 %v836_v3, %v835_v0 }
 0x152   :  { %v839_v61 = vadd.f32 %v838_v27, %v837_v48  ;;  %v1034_v8 = vadd.f32 %v1033_v2, %v1032_v31 }
 0x154   :  { %v1036_v13 = vadd.f32 %v1035_v7, %v1034_v8  ;;  %v841_v15 = vadd.f32 %v840_v23, %v839_v61 }
 0x156   :  { %v843_v19 = vadd.f32 %v842_v51, %v841_v15  ;;  %v1038_v57 = vadd.f32 %v1037_v16, %v1036_v13 }
 0x158   :  { %v1040_v14 = vadd.f32 %v1039_v45, %v1038_v57  ;;  %v845_v21 = vadd.f32 %v844_v46, %v843_v19 }
 0x15a   :  { %v847_v20 = vadd.f32 %v846_v11, %v845_v21  ;;  %v1042_v32 = vadd.f32 %v1041_v22, %v1040_v14 }
 0x15c   :  { %v849_v59 = vadd.f32 %v848_v36, %v847_v20  ;;  %v1044_v10 = vadd.f32 %v1043_v26, %v1042_v32 }
 0x15e   :  { %v850_v33 = vrot.slane %v849_v59, 4  ;;  %v1046_v35 = vadd.f32 %v1045_v5, %v1044_v10 }
 0x160   :  { %v851_v12 = vadd.f32 %v850_v33, %v849_v59  ;;  %v1047_v37 = vrot.slane %v1046_v35, 4 }
 0x162   :  { %v852_v38 = vrot.slane %v851_v12, 2  ;;  %v1048_v39 = vadd.f32 %v1047_v37, %v1046_v35 }
 0x164   :  { %v853_v40 = vadd.f32 %v852_v38, %v851_v12  ;;  %v1049_v42 = vrot.slane %v1048_v39, 2 }
 0x166   :  { %v854_v43 = vrot.slane %v853_v40, 1  ;;  %v1050_v18 = vadd.f32 %v1049_v42, %v1048_v39 }
 0x168   :  { %v1051_v29 = vrot.slane %v1050_v18, 1  ;;  %v855_v52 = vadd.f32 %v854_v43, %v853_v40 }
 0x16a   :  { %v1052_v30 = vadd.f32 %v1051_v29, %v1050_v18 }
 0x16c   :  { %v1054_v47 = vsel %vm1053_vm2, %v855_v52, %v1052_v30 }
 0x16d   :  { %1056 = vst.msk [vmem:[#allocation2] sm:$0x3] %vm1055_vm3, %v1054_v47 }
 0x16e   :  { %1323 = shalt.err (!%p1320_p4)
}
 0x16f   :  { %s1324_s19 = scalar_lea.hbm %s2210_s3, 32 }
 0x170   :  { %p1325_p5 = scmp.ne.s32.totalorder %s2210_s3, %s1324_s19  ;;  %p1328_p6 = scmp.lt.u32.totalorder %s1324_s19, %s2210_s3 }
 0x172   :  { %p1330_p7 = pnand %p1328_p6, %p1325_p5 }
 0x174   :  { %1333 = shalt.err (!%p1330_p7)
}
 0x175   :  { %1068 = dma.vmem_to_hbm [thread:$0]  %s1066_s15, 32, %s2210_s3, [#allocation3]  }
 0x176   :  { %1334 = dma.done.wait [#allocation3], 32  }
 0x177   :  { %1335 = vsyncadd [#allocation3], 4294967264 }
 0x178   :  { %1074 = vsyncpa [#allocation3], 1 }

</bundles_post_ra>
